<compile_context>
chip_gen: v7x
topology: tpu7x:2x2x1
jax: 0.10.0
libtpu: 0.0.40
codegen_flags: <defaults>
</compile_context>

<pallas_src>
import functools

import numpy as np
import jax
import jax.numpy as jnp
from jax.experimental import pallas as pl
from jax.experimental.pallas import tpu as pltpu

TIME_STEP = 10
C1, C2 = 16, 32
K = 3
LP = TIME_STEP // 2          # pooled length = 5
NCOL = LP * C2               # 160: conv2 / fc feature width
XCOLS = 16                   # x / conv1 contraction dim, padded 10 -> 16
HALF = 128                   # padded width of each time-parity half (real: 80)
N1 = 2 * HALF                # conv1 matmul output width = 256
W2_ROWS = HALF               # conv2 contraction rows (real: 80, padded to 128)


def _cnn_kernel(x_ref, w1_ref, b1_ref, w2_ref, b2_ref, wf_ref, bf_ref, out_ref,
                *, sub):
    # x_ref:  (tb, 16)  bf16   raw inputs (cols 10..15 zero; conv pad folded
    #                          into the Toeplitz weights)
    # w1_ref: (16, 256) bf16   conv1 Toeplitz, cols = half*128 + l*16 + c
    # b1_ref: (1, 256)  f32    conv1 bias tiled over (half, l); pad cols zero
    # w2_ref: (128,160) bf16   conv2 Toeplitz, rows = src*16+ci, cols = l*32+co
    # b2_ref: (1, 160)  f32
    # wf_ref: (1, 160)  f32    fc weight permuted to l*32+co order
    # bf_ref: (1, 1)    f32
    # out_ref:(tb, 1)   f32
    tb = x_ref.shape[0]
    nsub = tb // sub

    w1 = w1_ref[...]
    b1 = b1_ref[...]
    w2 = w2_ref[...]
    b2 = b2_ref[...]
    wf = wf_ref[...]
    bf = bf_ref[...]

    @pl.loop(0, nsub)
    def _(s):
        r0 = pl.multiple_of(s * sub, sub)
        x = x_ref[pl.ds(r0, sub), :]                                   # (sub,16)
        # conv1 + bias + ReLU: one MXU matmul (even-time half | odd-time half).
        h1 = jnp.dot(x, w1, preferred_element_type=jnp.float32) + b1   # (sub,256)
        h1 = jnp.maximum(h1, 0.0)
        # MaxPool1d(2): single VPU max of the two 128-lane (tile-aligned) halves.
        hp = jnp.maximum(h1[:, :HALF], h1[:, HALF:])                   # (sub,128)
        # conv2 + bias + ReLU: one MXU matmul (pad rows/cols are exact zeros).
        h2 = jnp.dot(hp.astype(jnp.bfloat16), w2,
                     preferred_element_type=jnp.float32) + b2          # (sub,160)
        h2 = jnp.maximum(h2, 0.0)
        # fc: contraction over all 160 features (VPU mul + XLU lane reduce).
        out = jnp.sum(h2 * wf, axis=1, keepdims=True) + bf             # (sub,1)
        out_ref[pl.ds(r0, sub), :] = out.astype(out_ref.dtype)


def pack_params(w1_pt, b1_pt, w2_pt, b2_pt, wf_pt, bf_pt):
    """Pack PyTorch-layout parameters into fused kernel slabs (host-side, once)."""
    w1_pt = np.asarray(w1_pt, np.float32)   # (16, 1, 3)
    b1_pt = np.asarray(b1_pt, np.float32)   # (16,)
    w2_pt = np.asarray(w2_pt, np.float32)   # (32, 16, 3)
    b2_pt = np.asarray(b2_pt, np.float32)   # (32,)
    wf_pt = np.asarray(wf_pt, np.float32)   # (1, 160)
    bf_pt = np.asarray(bf_pt, np.float32)   # (1,)

    # conv1 -> Toeplitz: rows = raw input position, cols = half*128 + l*16 + c
    # with t = 2*l + half; conv zero-padding absorbed (out-of-range taps skipped).
    w1 = np.zeros((XCOLS, N1), np.float32)
    b1 = np.zeros((1, N1), np.float32)
    for t in range(TIME_STEP):
        half, l = t % 2, t // 2
        c0 = half * HALF + l * C1
        b1[0, c0:c0 + C1] = b1_pt
        for k in range(K):
            src = t + k - 1                      # padding=1
            if 0 <= src < TIME_STEP:
                w1[src, c0:c0 + C1] = w1_pt[:, 0, k]

    # conv2 -> Toeplitz: rows = src*16 + ci (rows >= 80 stay zero), cols = l*32 + co.
    w2 = np.zeros((W2_ROWS, NCOL), np.float32)
    for l in range(LP):
        for k in range(K):
            src = l + k - 1                      # padding=1
            if 0 <= src < LP:
                w2[src * C1:(src + 1) * C1, l * C2:(l + 1) * C2] = w2_pt[:, :, k].T
    b2 = np.tile(b2_pt, LP)[None, :]             # (1, 160)

    # fc weight: PyTorch flatten order co*5 + l  ->  kernel order l*32 + co.
    wf = wf_pt[0].reshape(C2, LP).T.reshape(1, NCOL)
    bf = bf_pt.reshape(1, 1)

    return dict(
        w1=jnp.asarray(w1, jnp.bfloat16),
        b1=jnp.asarray(b1, jnp.float32),
        w2=jnp.asarray(w2, jnp.bfloat16),
        b2=jnp.asarray(b2, jnp.float32),
        wf=jnp.asarray(wf, jnp.float32),
        bf=jnp.asarray(bf, jnp.float32),
    )


def _round_up(n, m):
    return (n + m - 1) // m * m


def cnn_forward(x, params, *, block_b=1024, sub_rows=256):
    """x: (B, 1, TIME_STEP) like the PyTorch module. Returns (B, 1) f32."""
    assert block_b % sub_rows == 0 and block_b % 8 == 0
    B = x.shape[0]
    x2 = x.reshape(B, TIME_STEP).astype(jnp.bfloat16)
    x2 = jnp.pad(x2, ((0, 0), (0, XCOLS - TIME_STEP)))      # pad 10 -> 16 cols

    b8 = _round_up(B, 8)
    if b8 > block_b:
        tb = block_b
    elif b8 >= 2 * sub_rows:
        # Split into >=2 grid steps so the "parallel" batch axis can occupy
        # both TensorCores on v7x.
        tb = _round_up(-(-b8 // 2), 8)
    else:
        tb = b8
    bp = _round_up(B, tb)
    sub = sub_rows if tb % sub_rows == 0 else tb
    assert tb % sub == 0 and bp % tb == 0

    if bp != B:
        x2 = jnp.pad(x2, ((0, bp - B), (0, 0)))

    flops_per_row = 2 * (XCOLS * N1 + W2_ROWS * NCOL + NCOL)
    param_bytes = (XCOLS * N1 + W2_ROWS * NCOL) * 2 + (N1 + 2 * NCOL + 1) * 4
    cost = pl.CostEstimate(
        flops=bp * flops_per_row,
        transcendentals=0,
        bytes_accessed=bp * (XCOLS * 2 + 4) + param_bytes)

    out = pl.pallas_call(
        functools.partial(_cnn_kernel, sub=sub),
        out_shape=jax.ShapeDtypeStruct((bp, 1), jnp.float32),
        grid=(bp // tb,),
        in_specs=[
            pl.BlockSpec((tb, XCOLS), lambda i: (i, 0)),       # batch-tiled x
            pl.BlockSpec((XCOLS, N1), lambda i: (0, 0)),       # w1 (resident)
            pl.BlockSpec((1, N1), lambda i: (0, 0)),           # b1
            pl.BlockSpec((W2_ROWS, NCOL), lambda i: (0, 0)),   # w2
            pl.BlockSpec((1, NCOL), lambda i: (0, 0)),         # b2
            pl.BlockSpec((1, NCOL), lambda i: (0, 0)),         # wf
            pl.BlockSpec((1, 1), lambda i: (0, 0)),            # bf
        ],
        out_specs=pl.BlockSpec((tb, 1), lambda i: (i, 0)),
        compiler_params=pltpu.CompilerParams(
            dimension_semantics=("parallel",)),
        cost_estimate=cost,
    )(x2, params["w1"], params["b1"], params["w2"], params["b2"],
      params["wf"], params["bf"])
    return out[:B]


def torch_style_reference(x, w1_pt, b1_pt, w2_pt, b2_pt, wf_pt, bf_pt):
    """Pure-JAX f32 reference mirroring PyTorch NCL semantics exactly."""
    B, _, L = x.shape
    xp = jnp.pad(x, ((0, 0), (0, 0), (1, 1)))
    taps = jnp.stack([xp[:, :, k:k + L] for k in range(K)], axis=-1)    # (B,1,L,K)
    h1 = jnp.einsum('bclk,ock->bol', taps, w1_pt) + b1_pt[None, :, None]
    h1 = jnp.maximum(h1, 0.0)
    hp = jnp.max(h1.reshape(B, C1, L // 2, 2), axis=-1)                 # (B,C1,L/2)
    hpp = jnp.pad(hp, ((0, 0), (0, 0), (1, 1)))
    taps2 = jnp.stack([hpp[:, :, k:k + L // 2] for k in range(K)], axis=-1)
    h2 = jnp.einsum('bclk,ock->bol', taps2, w2_pt) + b2_pt[None, :, None]
    h2 = jnp.maximum(h2, 0.0)
    flat = h2.reshape(B, -1)                                            # (B, 160)
    return flat @ wf_pt.T + bf_pt[None, :]


if __name__ == "__main__":
    key = jax.random.PRNGKey(0)
    ks = jax.random.split(key, 8)

    # Deterministic synthetic parameters in PyTorch layouts.
    w1_pt = 0.1 * jax.random.normal(ks[0], (C1, 1, K), jnp.float32)      # Conv1d(1,16,3)
    b1_pt = 0.1 * jax.random.normal(ks[1], (C1,), jnp.float32)
    w2_pt = 0.1 * jax.random.normal(ks[2], (C2, C1, K), jnp.float32)     # Conv1d(16,32,3)
    b2_pt = 0.1 * jax.random.normal(ks[3], (C2,), jnp.float32)
    wf_pt = 0.1 * jax.random.normal(ks[4], (1, C2 * TIME_STEP // 2), jnp.float32)
    bf_pt = 0.1 * jax.random.normal(ks[5], (1,), jnp.float32)

    params = pack_params(w1_pt, b1_pt, w2_pt, b2_pt, wf_pt, bf_pt)
    fwd = jax.jit(cnn_forward)

    # Small batch: correctness (bf16 matmul operands -> relaxed tolerance).
    x_small = jax.random.normal(ks[6], (8, 1, TIME_STEP), jnp.float32)
    out_small = jax.block_until_ready(fwd(x_small, params))
    ref_small = torch_style_reference(x_small, w1_pt, b1_pt, w2_pt, b2_pt,
                                      wf_pt, bf_pt)
    assert out_small.shape == (8, 1)
    assert jnp.allclose(out_small, ref_small, atol=3e-2, rtol=3e-2), (
        out_small, ref_small)

    # Mid-size batch: exercises the multi-step grid, sub-tile loop and padding.
    x_mid = jax.random.normal(ks[7], (600, 1, TIME_STEP), jnp.float32)
    out_mid = jax.block_until_ready(fwd(x_mid, params))
    ref_mid = torch_style_reference(x_mid, w1_pt, b1_pt, w2_pt, b2_pt,
                                    wf_pt, bf_pt)
    assert out_mid.shape == (600, 1)
    assert jnp.allclose(out_mid, ref_mid, atol=3e-2, rtol=3e-2)

    print("KERNEL_OK")
</pallas_src>

<mosaic_0001>
module attributes {stable_mosaic.version = 11 : i64} {
  func.func @_cnn_kernel(%arg0: i32, %arg1: memref<8x16xbf16, #tpu.memory_space<vmem>>, %arg2: memref<16x256xbf16, #tpu.memory_space<vmem>>, %arg3: memref<1x256xf32, #tpu.memory_space<vmem>>, %arg4: memref<128x160xbf16, #tpu.memory_space<vmem>>, %arg5: memref<1x160xf32, #tpu.memory_space<vmem>>, %arg6: memref<1x160xf32, #tpu.memory_space<vmem>>, %arg7: memref<1x1xf32, #tpu.memory_space<vmem>>, %arg8: memref<8x1xf32, #tpu.memory_space<vmem>>) attributes {dimension_semantics = [#tpu.dimension_semantics<parallel>], iteration_bounds = array<i64: 1>, scalar_prefetch = 0 : i64, scratch_operands = 0 : i64, tpu.core_type = #tpu.core_type<tc>, window_params = [{transform_indices = @transform_0, window_bounds = array<i64: 8, 16>}, {pipeline_mode = #tpu.pipeline_mode<synchronous>, transform_indices = @transform_1, window_bounds = array<i64: 16, 256>}, {pipeline_mode = #tpu.pipeline_mode<synchronous>, transform_indices = @transform_2, window_bounds = array<i64: 1, 256>}, {pipeline_mode = #tpu.pipeline_mode<synchronous>, transform_indices = @transform_3, window_bounds = array<i64: 128, 160>}, {pipeline_mode = #tpu.pipeline_mode<synchronous>, transform_indices = @transform_4, window_bounds = array<i64: 1, 160>}, {pipeline_mode = #tpu.pipeline_mode<synchronous>, transform_indices = @transform_5, window_bounds = array<i64: 1, 160>}, {pipeline_mode = #tpu.pipeline_mode<synchronous>, transform_indices = @transform_6, window_bounds = array<i64: 1, 1>}, {transform_indices = @transform_7, window_bounds = array<i64: 8, 1>}]} {
    %c0 = arith.constant 0 : index
    %c0_0 = arith.constant 0 : index
    %0 = vector.load %arg2[%c0, %c0_0] : memref<16x256xbf16, #tpu.memory_space<vmem>>, vector<16x256xbf16>
    %c0_1 = arith.constant 0 : index
    %c0_2 = arith.constant 0 : index
    %1 = vector.load %arg3[%c0_1, %c0_2] : memref<1x256xf32, #tpu.memory_space<vmem>>, vector<1x256xf32>
    %c0_3 = arith.constant 0 : index
    %c0_4 = arith.constant 0 : index
    %2 = vector.load %arg4[%c0_3, %c0_4] : memref<128x160xbf16, #tpu.memory_space<vmem>>, vector<128x160xbf16>
    %c0_5 = arith.constant 0 : index
    %c0_6 = arith.constant 0 : index
    %3 = vector.load %arg5[%c0_5, %c0_6] : memref<1x160xf32, #tpu.memory_space<vmem>>, vector<1x160xf32>
    %c0_7 = arith.constant 0 : index
    %c0_8 = arith.constant 0 : index
    %4 = vector.load %arg6[%c0_7, %c0_8] : memref<1x160xf32, #tpu.memory_space<vmem>>, vector<1x160xf32>
    %c0_9 = arith.constant 0 : index
    %c0_10 = arith.constant 0 : index
    %5 = vector.load %arg7[%c0_9, %c0_10] : memref<1x1xf32, #tpu.memory_space<vmem>>, vector<1x1xf32>
    %c0_i32 = arith.constant 0 : i32
    %c1_i32 = arith.constant 1 : i32
    %6 = arith.muli %c0_i32, %c1_i32 : i32
    %c0_i32_11 = arith.constant 0 : i32
    %7 = arith.addi %c0_i32_11, %6 : i32
    %c8_i32 = arith.constant 8 : i32
    %8 = arith.muli %7, %c8_i32 : i32
    %9 = tpu.assume_multiple %8, 8 : i32
    %10 = arith.index_cast %9 : i32 to index
    %c0_12 = arith.constant 0 : index
    %11 = vector.load %arg1[%10, %c0_12] : memref<8x16xbf16, #tpu.memory_space<vmem>>, vector<8x16xbf16>
    %cst = arith.constant dense<0.000000e+00> : vector<8x256xf32>
    %12 = tpu.matmul %11, %0, %cst {dimension_numbers = #tpu.dot_dimension_numbers<[1], [0], [0], [1], [0, 0, 1, 1], [], []>} : vector<8x16xbf16>, vector<16x256xbf16>, vector<8x256xf32> -> vector<8x256xf32>
    %13 = vector.broadcast %1 : vector<1x256xf32> to vector<8x256xf32>
    %14 = arith.addf %12, %13 : vector<8x256xf32>
    %cst_13 = arith.constant 0.000000e+00 : f32
    %15 = vector.broadcast %cst_13 : f32 to vector<8x256xf32>
    %16 = arith.maximumf %14, %15 : vector<8x256xf32>
    %17 = vector.extract_strided_slice %16 {offsets = [0, 0], sizes = [8, 128], strides = [1, 1]} : vector<8x256xf32> to vector<8x128xf32>
    %18 = vector.extract_strided_slice %16 {offsets = [0, 128], sizes = [8, 128], strides = [1, 1]} : vector<8x256xf32> to vector<8x128xf32>
    %19 = arith.maximumf %17, %18 : vector<8x128xf32>
    %20 = arith.truncf %19 : vector<8x128xf32> to vector<8x128xbf16>
    %cst_14 = arith.constant dense<0.000000e+00> : vector<8x160xf32>
    %21 = tpu.matmul %20, %2, %cst_14 {dimension_numbers = #tpu.dot_dimension_numbers<[1], [0], [0], [1], [0, 0, 1, 1], [], []>} : vector<8x128xbf16>, vector<128x160xbf16>, vector<8x160xf32> -> vector<8x160xf32>
    %22 = vector.broadcast %3 : vector<1x160xf32> to vector<8x160xf32>
    %23 = arith.addf %21, %22 : vector<8x160xf32>
    %cst_15 = arith.constant 0.000000e+00 : f32
    %24 = vector.broadcast %cst_15 : f32 to vector<8x160xf32>
    %25 = arith.maximumf %23, %24 : vector<8x160xf32>
    %26 = vector.broadcast %4 : vector<1x160xf32> to vector<8x160xf32>
    %27 = arith.mulf %25, %26 : vector<8x160xf32>
    %cst_16 = arith.constant dense<0.000000e+00> : vector<8xf32>
    %28 = vector.multi_reduction <add>, %27, %cst_16 [1] : vector<8x160xf32> to vector<8xf32>
    %29 = vector.shape_cast %28 : vector<8xf32> to vector<8x1xf32>
    %30 = vector.broadcast %5 : vector<1x1xf32> to vector<8x1xf32>
    %31 = arith.addf %29, %30 : vector<8x1xf32>
    %32 = arith.index_cast %9 : i32 to index
    %c0_17 = arith.constant 0 : index
    %33 = vector.load %arg8[%32, %c0_17] : memref<8x1xf32, #tpu.memory_space<vmem>>, vector<8x1xf32>
    tpu.vector_store %arg8[%32, %c0_17], %31 {strides = array<i32>} : memref<8x1xf32, #tpu.memory_space<vmem>>, vector<8x1xf32>,
    %c1_i32_18 = arith.constant 1 : i32
    return
  }
  func.func @transform_0(%arg0: i32) -> (i32, i32) {
    %c0_i32 = arith.constant 0 : i32
    %c0_i32_0 = arith.constant 0 : i32
    return %arg0, %c0_i32 : i32, i32
  }
  func.func @transform_1(%arg0: i32) -> (i32, i32) {
    %c0_i32 = arith.constant 0 : i32
    %c0_i32_0 = arith.constant 0 : i32
    %c0_i32_1 = arith.constant 0 : i32
    return %c0_i32, %c0_i32_0 : i32, i32
  }
  func.func @transform_2(%arg0: i32) -> (i32, i32) {
    %c0_i32 = arith.constant 0 : i32
    %c0_i32_0 = arith.constant 0 : i32
    %c0_i32_1 = arith.constant 0 : i32
    return %c0_i32, %c0_i32_0 : i32, i32
  }
  func.func @transform_3(%arg0: i32) -> (i32, i32) {
    %c0_i32 = arith.constant 0 : i32
    %c0_i32_0 = arith.constant 0 : i32
    %c0_i32_1 = arith.constant 0 : i32
    return %c0_i32, %c0_i32_0 : i32, i32
  }
  func.func @transform_4(%arg0: i32) -> (i32, i32) {
    %c0_i32 = arith.constant 0 : i32
    %c0_i32_0 = arith.constant 0 : i32
    %c0_i32_1 = arith.constant 0 : i32
    return %c0_i32, %c0_i32_0 : i32, i32
  }
  func.func @transform_5(%arg0: i32) -> (i32, i32) {
    %c0_i32 = arith.constant 0 : i32
    %c0_i32_0 = arith.constant 0 : i32
    %c0_i32_1 = arith.constant 0 : i32
    return %c0_i32, %c0_i32_0 : i32, i32
  }
  func.func @transform_6(%arg0: i32) -> (i32, i32) {
    %c0_i32 = arith.constant 0 : i32
    %c0_i32_0 = arith.constant 0 : i32
    %c0_i32_1 = arith.constant 0 : i32
    return %c0_i32, %c0_i32_0 : i32, i32
  }
  func.func @transform_7(%arg0: i32) -> (i32, i32) {
    %c0_i32 = arith.constant 0 : i32
    %c0_i32_0 = arith.constant 0 : i32
    return %arg0, %c0_i32 : i32, i32
  }
}

</mosaic_0001>

<bundles_post_ra>
// kernel: cnn_forward.1
= control target key start
LH: loop header
LB: loop body
LE: loop exit
PB: predicated region body
PF: predicated region fallthrough
CT: control target
= control target key end

     0   :  { %v335_v1 = vmov 0   ;;  %vm73_vm0 = vcmask 130048   ;;  %v53_v20 = vlaneseq  ;;  %vm269_vm1 = vcmask 261120   ;;  %s448_s1 = inlined_call_operand.vmem [shape: bf16[16,256], index: 1, kind: input, shape index: {}]   ;;  %s449_s0 = inlined_call_operand.vmem [shape: bf16[8,16], index: 0, kind: input, shape index: {}]   ;;  %s450_s3 = inlined_call_operand.vmem [shape: bf16[128,160], index: 3, kind: input, shape index: {}]   ;;  %s451_s2 = inlined_call_operand.vmem [shape: f32[1,256], index: 2, kind: input, shape index: {}]   ;;  %s452_s6 = inlined_call_operand.<no memory space> [shape: f32[1,1], index: 6, kind: input, shape index: {}]   ;;  %s453_s4 = inlined_call_operand.vmem [shape: f32[1,160], index: 4, kind: input, shape index: {}]   ;;  %s454_s5 = inlined_call_operand.vmem [shape: f32[1,160], index: 5, kind: input, shape index: {}]   ;;  %s455_s7 = inlined_call_operand.vmem [shape: f32[8,1], index: 7, kind: output, shape index: {}]  }
   0x1   :  { %v308_v0 = vld [vmem:[%s448_s1 + $0x4] ss:$8 sps:$4 sm:$0xff]   ;;  %109 = vmatprep.mubr.bf16.mxu0 %v335_v1  ;;  %245 = vmatprep.mubr.bf16.mxu1 %v335_v1  ;;  %v310_v2 = vld [vmem:[%s448_s1] ss:$8 sps:$4 sm:$0xff]   ;;  %v314_v6 = vld [vmem:[%s450_s3 + $0x14] ss:$8 sps:$4 sm:$0xff]   ;;  %v12_v37 = vstv %s452_s6 }
   0x2   :  { %v51_v3 = vld [vmem:[%s449_s0] sm:$0xf]  ;;  %77 = vmatprep.subr.bf16.mxu0 %v308_v0  ;;  %v311_v4 = vld [vmem:[%s450_s3 + $0x4] ss:$8 sps:$4 sm:$0xff]   ;;  %v316_v7 = vld [vmem:[%s450_s3 + $0x10] ss:$8 sps:$4 sm:$0xff]  }
   0x3   :  { %v313_v5 = vld [vmem:[%s450_s3] ss:$8 sps:$4 sm:$0xff]   ;;  %78 = vmatpush1.bf16.msra.mxu0 %v310_v2  ;;  %213 = vmatprep.subr.bf16.mxu1 %v311_v4  ;;  %v317_v8 = vld [vmem:[%s450_s3 + $0x24] ss:$8 sps:$4 sm:$0xff]   ;;  %v320_v10 = vld [vmem:[%s450_s3 + $0x34] ss:$8 sps:$4 sm:$0xff]  }
   0x4   :  { %214 = vmatpush1.bf16.msra.mxu1 %v313_v5  ;;  %v319_v9 = vld [vmem:[%s450_s3 + $0x20] ss:$8 sps:$4 sm:$0xff]   ;;  %v322_v11 = vld [vmem:[%s450_s3 + $0x30] ss:$8 sps:$4 sm:$0xff]   ;;  %v323_v12 = vld [vmem:[%s450_s3 + $0x44] ss:$8 sps:$4 sm:$0xff]  }
   0x5   :  { %215 = vmatprep.subr.bf16.mxu1 %v314_v6  ;;  %v325_v13 = vld [vmem:[%s450_s3 + $0x40] ss:$8 sps:$4 sm:$0xff]   ;;  %v326_v14 = vld [vmem:[%s450_s3 + $0x54] ss:$8 sps:$4 sm:$0xff]   ;;  %v328_v15 = vld [vmem:[%s450_s3 + $0x50] ss:$8 sps:$4 sm:$0xff]  }
   0x6   :  { %289 = vmatmul.mubr.msk.bf16.vlgmr.msra.gmra.mrb[0].mxu0 %vm73_vm0, %v51_v3  ;;  %v329_v16 = vld [vmem:[%s450_s3 + $0x64] ss:$8 sps:$4 sm:$0xff]   ;;  %v331_v17 = vld [vmem:[%s450_s3 + $0x60] ss:$8 sps:$4 sm:$0xff]   ;;  %v332_v18 = vld [vmem:[%s450_s3 + $0x74] ss:$8 sps:$4 sm:$0xff]  }
   0x7   :  { %v334_v19 = vld [vmem:[%s450_s3 + $0x70] ss:$8 sps:$4 sm:$0xff]   ;;  %v54_v21 = vshrl.u32 %v53_v20, 7  ;;  %v31_v23 = vld [vmem:[%s451_s2] sm:$0x3]  ;;  %vm281_vm2 = vcmask 7168  }
   0x8   :  { %216 = vmatpush1.bf16.msra.mxu1 %v316_v7  ;;  %13 = vst [vmem:[#allocation2] sm:$0x1] %v12_v37  ;;  %v48_v38 = vld [vmem:[%s453_s4] sm:$0x3] }
   0x9   :  { %217 = vmatprep.subr.bf16.mxu1 %v317_v8  ;;  %v55_v22 = vsub.s32 0, %v54_v21  ;;  %v59_v24 = vsub.s32 1, %v54_v21  ;;  %v49_v41 = vld [vmem:[%s454_s5] sm:$0x3] }
   0xb   :  { %v56_v25 = vrot.slane %v31_v23, %v55_v22  ;;  %v60_v26 = vrot.slane %v31_v23, %v59_v24  ;;  %v126_v39 = vrot.slane %v48_v38, %v55_v22  ;;  %v130_v40 = vrot.slane %v48_v38, %v59_v24 }
   0xc   :  { %218 = vmatpush1.bf16.msra.mxu1 %v319_v9  ;;  %v264_v47 = vrot.slane %v49_v41, %v59_v24  ;;  %v260_v50 = vrot.slane %v49_v41, %v55_v22 }
   0xd   :  { %219 = vmatprep.subr.bf16.mxu1 %v320_v10 }
   0xf   :  { %v306_v56 = vld [vmem:[#allocation2] ss:$0 sm:$0xff] }
  0x10   :  { %220 = vmatpush1.bf16.msra.mxu1 %v322_v11 }
  0x11   :  { %221 = vmatprep.subr.bf16.mxu1 %v323_v12 }
  0x14   :  { %222 = vmatpush1.bf16.msra.mxu1 %v325_v13 }
  0x15   :  { %223 = vmatprep.subr.bf16.mxu1 %v326_v14 }
  0x18   :  { %224 = vmatpush1.bf16.msra.mxu1 %v328_v15 }
  0x19   :  { %225 = vmatprep.subr.bf16.mxu1 %v329_v16 }
  0x1c   :  { %226 = vmatpush1.bf16.msra.mxu1 %v331_v17 }
  0x1d   :  { %227 = vmatprep.subr.bf16.mxu1 %v332_v18 }
  0x20   :  { %228 = vmatpush1.bf16.msra.mxu1 %v334_v19 }
  0xd9   :  { %v111_v27 = vpop.f32.mrb[0].mxu0 }
  0xda   :  { %v112_v28 = vadd.f32 %v111_v27, %v56_v25  ;;  %v113_v29 = vpop.f32.mrb[1].mxu0 }
  0xdb   :  { %v114_v30 = vadd.f32 %v113_v29, %v60_v26  ;;  %v115_v31 = vpop.f32.mrb[2].mxu0 }
  0xdc   :  { %v118_v32 = vmax.f32 %v112_v28, 0.0  ;;  %v116_v33 = vpop.f32.mrb[3].mxu0 }
  0xdd   :  { %v119_v34 = vmax.f32 %v114_v30, 0.0 }
  0xdf   :  { %v120_v35 = vmax.f32 %v118_v32, %v119_v34 }
  0xe1   :  { %v121_v36 = vpack.c.bf16 %v120_v35, %v120_v35 }
  0xe3   :  { %246 = vmatmul.mubr.bf16.vlgmr.msra.gmra.mrb[0].mxu1 %v121_v36 }
 0x1b6   :  { %v247_v42 = vpop.f32.mrb[0].mxu1 }
 0x1b7   :  { %v248_v43 = vadd.f32 %v247_v42, %v126_v39  ;;  %v249_v44 = vpop.f32.mrb[1].mxu1 }
 0x1b8   :  { %v250_v45 = vadd.f32 %v249_v44, %v130_v40  ;;  %v251_v46 = vpop.f32.mrb[2].mxu1 }
 0x1b9   :  { %v254_v48 = vmax.f32 %v248_v43, 0.0  ;;  %v252_v49 = vpop.f32.mrb[3].mxu1 }
 0x1ba   :  { %v255_v51 = vmax.f32 %v250_v45, 0.0 }
 0x1bb   :  { %v267_v53 = vmul.f32 %v260_v50, %v254_v48 }
 0x1bc   :  { %v268_v52 = vmul.f32 %v264_v47, %v255_v51 }
 0x1be   :  { %v270_v54 = vsel %vm269_vm1, %v268_v52, 0.0 }
 0x1bf   :  { %v271_v55 = vadd.f32 %v270_v54, %v267_v53 }
 0x1c1   :  { %272 = vadd.xlane.f32.xlu0 %v271_v55 }
 0x24e   :  { %v273_v57 = vpop.xlane.xlu0 %272 }
 0x24f   :  { %v280_v58 = vadd.f32 %v306_v56, %v273_v57 }
 0x251   :  { %282 = vst.msk [vmem:[%s455_s7] sm:$0xff] %vm281_vm2, %v280_v58 }

</bundles_post_ra>
